<compile_context>
chip_gen: v7x
topology: tpu7x:2x2x1
jax: 0.10.0
libtpu: 0.0.40
codegen_flags: <defaults>
</compile_context>

<pallas_src>
import math
import numpy as np

import jax
import jax.numpy as jnp
from jax.experimental import pallas as pl
from jax.experimental.pallas import tpu as pltpu


# ---------------------------------------------------------------------------
# Deterministic parameter setup (pure numpy, mirrors the PyTorch __init__).
# ---------------------------------------------------------------------------
def _euler_angles_to_rotation_matrix(theta):
    R_x = np.array([[1, 0, 0],
                    [0, math.cos(theta[0]), -math.sin(theta[0])],
                    [0, math.sin(theta[0]), math.cos(theta[0])]])
    R_y = np.array([[math.cos(theta[1]), 0, math.sin(theta[1])],
                    [0, 1, 0],
                    [-math.sin(theta[1]), 0, math.cos(theta[1])]])
    R_z = np.array([[math.cos(theta[2]), -math.sin(theta[2]), 0],
                    [math.sin(theta[2]), math.cos(theta[2]), 0],
                    [0, 0, 1]])
    return np.dot(R_z, np.dot(R_y, R_x))


def THT_inv_matrix(height, width, scale=1.0):
    K1 = np.array([[1796.6985372203135, 0.0, 982.1333137421029],
                   [0.0, 1793.8563682988065, 696.3526269889819],
                   [0.0, 0.0, 1.0]])
    K2 = np.array([[967.1103975517259, 0.0, 967.1468712919049],
                   [0.0, 964.5298875990683, 629.2707542395874],
                   [0.0, 0.0, 1.0]])
    S = np.array([[scale, scale, scale],
                  [scale, scale, scale],
                  [1.0, 1.0, 1.0]])
    R = _euler_angles_to_rotation_matrix((-0.01, 0.01, 0.005))
    # element-wise K*S, then matrix products (same as np.asmatrix semantics)
    H = (K1 * S) @ R.transpose() @ np.linalg.inv(K2 * S)
    T = np.array([[2.0 / width, 0.0, -1.0],
                  [0.0, 2.0 / height, -1.0],
                  [0.0, 0.0, 1.0]])
    HT_inv = np.matmul(H, np.linalg.inv(T))
    THT_inv = np.matmul(T, HT_inv)
    return THT_inv


# ---------------------------------------------------------------------------
# Pallas kernel: single-step broadcast of the flattened homography to (N, 9).
# ---------------------------------------------------------------------------
def _broadcast_kernel(h_ref, out_ref):
    # h_ref:   (1, 9) flattened 3x3 homography, resident in VMEM
    # out_ref: (N, 9) full output slab, written in one unmasked sublane-broadcast
    out_ref[...] = jnp.broadcast_to(h_ref[...], out_ref.shape)


def homography_forward(homo_3x3: jnp.ndarray, N: int) -> jnp.ndarray:
    """Equivalent of Homography.forward(): tile `homo_3x3` N times -> (N,3,3) f32."""
    # Flatten to a lane-contiguous (1, 9) row in the wrapper (layout plumbing,
    # not compute); the kernel writes one dense (N, 9) slab in a single
    # invocation — no grid, no per-step pipeline overhead, one input DMA.
    homo_flat = homo_3x3.astype(jnp.float32).reshape(1, 9)
    out_flat = pl.pallas_call(
        _broadcast_kernel,
        out_shape=jax.ShapeDtypeStruct((N, 9), jnp.float32),
        in_specs=[pl.BlockSpec(memory_space=pltpu.MemorySpace.VMEM)],
        out_specs=pl.BlockSpec(memory_space=pltpu.MemorySpace.VMEM),
    )(homo_flat)
    return out_flat.reshape(N, 3, 3)


class Homography:
    """JAX/Pallas port of the PyTorch Homography module."""

    def __init__(self, direc, height, width, N, scale):
        assert direc in ("120_60", "60_120")
        self.N = N
        self.THT_inv = THT_inv_matrix(height, width, scale)
        if direc == "120_60":
            homo = np.linalg.inv(self.THT_inv)
        else:  # "60_120"
            homo = self.THT_inv
        # float64 numpy -> jax array (downcast to f32 with default x64=off),
        # matching the PyTorch assignment into a float32 torch.Tensor.
        self.homo = jnp.asarray(homo, dtype=jnp.float32)

    def forward(self):
        return homography_forward(self.homo, self.N)


# ---------------------------------------------------------------------------
if __name__ == "__main__":
    # No tensor inputs to forward(); everything is deterministic from __init__.
    _ = jax.random.PRNGKey(0)  # unused: module has no random inputs

    N, height, width, scale = 8, 16, 16, 1.0
    module = Homography(direc="60_120", height=height, width=width, N=N, scale=scale)

    out = module.forward()
    out = jax.block_until_ready(out)

    # Verify against the reference semantics (numpy broadcast, cast to f32).
    ref = np.broadcast_to(
        np.asarray(THT_inv_matrix(height, width, scale), dtype=np.float32)[None],
        (N, 3, 3))
    assert out.shape == (N, 3, 3)
    assert out.dtype == jnp.float32
    np.testing.assert_allclose(np.asarray(out), ref, rtol=1e-6, atol=1e-6)

    # Also exercise the other direction for coverage.
    module_inv = Homography(direc="120_60", height=height, width=width, N=N, scale=scale)
    out_inv = jax.block_until_ready(module_inv.forward())
    ref_inv = np.broadcast_to(
        np.linalg.inv(THT_inv_matrix(height, width, scale)).astype(np.float32)[None],
        (N, 3, 3))
    np.testing.assert_allclose(np.asarray(out_inv), ref_inv, rtol=1e-6, atol=1e-6)

    print("KERNEL_OK")
</pallas_src>

<mosaic_0001>
module attributes {stable_mosaic.version = 11 : i64} {
  func.func @_broadcast_kernel(%arg0: memref<1x9xf32, #tpu.memory_space<vmem>>, %arg1: memref<8x9xf32, #tpu.memory_space<vmem>>) attributes {dimension_semantics = [], scalar_prefetch = 0 : i64, scratch_operands = 0 : i64, tpu.core_type = #tpu.core_type<tc>} {
    %c0 = arith.constant 0 : index
    %c0_0 = arith.constant 0 : index
    %0 = vector.load %arg0[%c0, %c0_0] : memref<1x9xf32, #tpu.memory_space<vmem>>, vector<1x9xf32>
    %1 = vector.shape_cast %0 : vector<1x9xf32> to vector<1x9xf32>
    %2 = vector.broadcast %1 : vector<1x9xf32> to vector<8x9xf32>
    %c0_1 = arith.constant 0 : index
    %c0_2 = arith.constant 0 : index
    %3 = vector.load %arg1[%c0_1, %c0_2] : memref<8x9xf32, #tpu.memory_space<vmem>>, vector<8x9xf32>
    tpu.vector_store %arg1[%c0_1, %c0_2], %2 {strides = array<i32>} : memref<8x9xf32, #tpu.memory_space<vmem>>, vector<8x9xf32>,
    return
  }
}

</mosaic_0001>

<bundles_post_ra>
// kernel: tpu_custom_call.1
= control target key start
LH: loop header
LB: loop body
LE: loop exit
PB: predicated region body
PF: predicated region fallthrough
CT: control target
= control target key end

     0   :  { %6 = vsyncpa [#allocation3], 0  ;;  %s132_s0 = inlined_call_operand.hbm [shape: f32[1,9], index: 0, kind: input, shape index: {}]   ;;  %s133_s1 = inlined_call_operand.hbm [shape: f32[8,9], index: 1, kind: output, shape index: {}]  }
   0x1   :  { %7 = vsyncpa [#allocation4], 0  ;;  %s96_s6 = smov [#allocation2]   ;;  %s48_s10 = scalar_lea.hbm %s132_s0, 16 }
   0x2   :  { %s14_s7 = sshll.u32 %s96_s6, 4  ;;  %p49_p0 = scmp.ne.s32.totalorder %s132_s0, %s48_s10  ;;  %s15_s7 = int_to_ptr.vmem [resolvable:$true] %s14_s7 }
   0x3   :  { %p52_p1 = scmp.lt.u32.totalorder %s48_s10, %s132_s0 }
   0x5   :  { %p54_p2 = pnand %p52_p1, %p49_p0 }
   0x7   :  { %57 = shalt.err (!%p54_p2)
}
   0x8   :  { %s58_s15 = scalar_lea.vmem %s15_s7, 16  ;;  %s62_s16 = scalar_lea.vmem %s15_s7, 32 }
   0x9   :  { %p59_p3 = scmp.ne.s32.totalorder %s15_s7, %s58_s15  ;;  %p63_p4 = scmp.lt.s32.totalorder %s15_s7, %s15_s7 }
   0xa   :  { %p64_p5 = scmp.lt.s32.totalorder %s62_s16, %s58_s15 }
   0xc   :  { %p65_p6 = por %p64_p5, %p63_p4 }
   0xe   :  { %p66_p7 = pnand %p65_p6, %p59_p3 }
  0x10   :  { %69 = shalt.err (!%p66_p7)
}
  0x11   :  { %17 = dma.hbm_to_vmem [thread:$0]  %s132_s0, 16, %s15_s7, [#allocation3]  }
  0x12   :  { %92 = dma.done.wait [#allocation3], 16  }
  0x13   :  { %93 = vsyncadd [#allocation3], 4294967280  ;;  %s97_s19 = smov [#allocation5]   ;;  %vm28_vm0 = vcmask 72704   ;;  %v45_v0 = vld [vmem:[#allocation2] ss:$0 sm:$0xff] }
  0x14   :  { %s36_s20 = sshll.u32 %s97_s19, 4  ;;  %29 = vst.msk [vmem:[#allocation5] sm:$0xff] %vm28_vm0, %v45_v0  ;;  %s37_s20 = int_to_ptr.vmem [resolvable:$true] %s36_s20 }
  0x15   :  { %s70_s21 = scalar_lea.vmem %s37_s20, 128  ;;  %p75_p9 = scmp.lt.s32.totalorder %s37_s20, %s37_s20 }
  0x16   :  { %p71_p8 = scmp.ne.s32.totalorder %s37_s20, %s70_s21  ;;  %p76_p10 = scmp.lt.s32.totalorder %s70_s21, %s70_s21 }
  0x18   :  { %p77_p11 = por %p76_p10, %p75_p9 }
  0x1a   :  { %p78_p12 = pnand %p77_p11, %p71_p8 }
  0x1c   :  { %81 = shalt.err (!%p78_p12)
}
  0x1d   :  { %s82_s24 = scalar_lea.hbm %s133_s1, 128 }
  0x1e   :  { %p83_p13 = scmp.ne.s32.totalorder %s133_s1, %s82_s24  ;;  %p86_p0 = scmp.lt.u32.totalorder %s82_s24, %s133_s1 }
  0x20   :  { %p88_p1 = pnand %p86_p0, %p83_p13 }
  0x22   :  { %91 = shalt.err (!%p88_p1)
}
  0x23   :  { %39 = dma.vmem_to_hbm [thread:$0]  %s37_s20, 128, %s133_s1, [#allocation4]  }
  0x24   :  { %94 = dma.done.wait [#allocation4], 128  }
  0x25   :  { %95 = vsyncadd [#allocation4], 4294967168 }
  0x26   :  { %43 = vsyncpa [#allocation3], 1 }
  0x27   :  { %44 = vsyncpa [#allocation4], 1 }

</bundles_post_ra>
